<compile_context>
chip_gen: v5e
topology: v5e:2x2
jax: 0.10.0
libtpu: 0.0.40
codegen_flags: <defaults>
</compile_context>

<pallas_src>
import functools

import jax
import jax.numpy as jnp
from jax.experimental import pallas as pl
from jax.experimental.pallas import tpu as pltpu


def _ce2d_kernel(logits_ref, tgt_ref, w_ref, num_ref, den_ref,
                 num_acc, den_acc, *, hw, ignore_label):
    o = pl.program_id(1)            # parallel spatial chunk within the image
    i = pl.program_id(2)            # inner (reduction) step
    n_inner = pl.num_programs(2)

    @pl.when(i == 0)
    def _init():
        num_acc[...] = jnp.zeros_like(num_acc)
        den_acc[...] = jnp.zeros_like(den_acc)

    x = logits_ref[0].astype(jnp.float32)          # (C, T): classes on sublanes
    C, T = x.shape

    # Numerically-stable log_softmax over the class (sublane) axis, per pixel.
    m = jnp.max(x, axis=0, keepdims=True)          # (1, T)
    z = x - m                                      # (C, T), z <= 0
    lse = jnp.log(jnp.sum(jnp.exp(z), axis=0, keepdims=True))   # (1, T)

    tgt = tgt_ref[0]                               # (1, T) int32
    cls = jax.lax.broadcasted_iota(jnp.int32, (C, T), 0)        # sublane iota
    oh = cls == tgt                                # (C, T) one-hot of target

    w = w_ref[...].astype(jnp.float32)             # (C, 1) class weights
    picked_z = jnp.sum(jnp.where(oh, z, 0.0), axis=0, keepdims=True)   # (1, T)
    picked_w = jnp.sum(jnp.where(oh, w, 0.0), axis=0, keepdims=True)   # (1, T)

    # Per-pixel weighted NLL: w[t] * (lse - z[t]) = w[t] * (-log p[t]).
    nll = picked_w * (lse - picked_z)              # (1, T)

    # Validity: pixel in-bounds (ragged last block) and not ignore_label.
    pos = jax.lax.broadcasted_iota(jnp.int32, (1, T), 1)
    start = (o * n_inner + i) * T                  # pixel offset within image
    inb = (start + pos) < hw
    valid = jnp.logical_and(inb, tgt != ignore_label)

    num_acc[...] += jnp.where(valid, nll, 0.0)
    den_acc[...] += jnp.where(valid, picked_w, 0.0)

    @pl.when(i == n_inner - 1)
    def _finalize():
        tot_n = jnp.sum(num_acc[...], axis=1, keepdims=True)    # (1, 1)
        tot_d = jnp.sum(den_acc[...], axis=1, keepdims=True)    # (1, 1)
        num_ref[...] = tot_n.reshape(num_ref.shape)
        den_ref[...] = tot_d.reshape(den_ref.shape)


def _pick_tile_hw(hw, c, itemsize, requested, vmem_budget):
    """Largest lane-tile (multiple of 128, or the full spatial extent) that keeps
    the double-buffered input streams inside a conservative VMEM budget."""
    hw_padded = ((hw + 127) // 128) * 128
    bytes_per_pixel = c * itemsize + 4             # logits slice + int32 target
    budget_tile = max(128, (vmem_budget // (2 * bytes_per_pixel)) // 128 * 128)
    t = 8192 if requested is None else requested
    t = max(128, (min(t, budget_tile, hw_padded) // 128) * 128)
    if t >= hw:
        return hw                                  # one full-extent block
    return t                                       # ragged last block -> masked


def cross_entropy_loss_2d(outputs, targets, weight=None, ignore_label=255,
                          tile_hw=None, vmem_budget_bytes=16 * 1024 * 1024):
    """outputs: (N, C, H, W) float (f32 or bf16); targets: (N, H, W) int.
    Returns scalar loss matching nn.NLLLoss(weight, ignore_index)(log_softmax)."""
    N, C, H, W = outputs.shape
    HW = H * W

    logits = outputs.reshape(N, C, HW)                    # free reshape, no copy
    tgt = targets.reshape(N, 1, HW).astype(jnp.int32)
    if weight is None:
        weight = jnp.ones((C,), jnp.float32)
    w = jnp.asarray(weight, jnp.float32).reshape(C, 1)

    t = _pick_tile_hw(HW, C, outputs.dtype.itemsize, tile_hw, vmem_budget_bytes)
    num_hw_blocks = -(-HW // t)

    # Expose >=2 parallel chunks for v7x megacore even when N == 1.
    hw_outer = 2 if (N == 1 and num_hw_blocks >= 2 and num_hw_blocks % 2 == 0) else 1
    hw_inner = num_hw_blocks // hw_outer

    grid = (N, hw_outer, hw_inner)
    kernel = functools.partial(_ce2d_kernel, hw=HW, ignore_label=ignore_label)

    num_p, den_p = pl.pallas_call(
        kernel,
        out_shape=(jax.ShapeDtypeStruct((N, hw_outer, 1, 1), jnp.float32),
                   jax.ShapeDtypeStruct((N, hw_outer, 1, 1), jnp.float32)),
        grid_spec=pltpu.PrefetchScalarGridSpec(
            num_scalar_prefetch=0,
            grid=grid,
            in_specs=[
                pl.BlockSpec((1, C, t), lambda n, o, i: (n, 0, o * hw_inner + i)),
                pl.BlockSpec((1, 1, t), lambda n, o, i: (n, 0, o * hw_inner + i)),
                pl.BlockSpec((C, 1), lambda n, o, i: (0, 0)),
            ],
            out_specs=[
                pl.BlockSpec((1, 1, 1, 1), lambda n, o, i: (n, o, 0, 0)),
                pl.BlockSpec((1, 1, 1, 1), lambda n, o, i: (n, o, 0, 0)),
            ],
            scratch_shapes=[pltpu.VMEM((1, t), jnp.float32),
                            pltpu.VMEM((1, t), jnp.float32)],
        ),
        compiler_params=pltpu.CompilerParams(
            dimension_semantics=("parallel", "parallel", "arbitrary"),
            vmem_limit_bytes=32 * 1024 * 1024),
    )(logits, tgt, w)

    # PyTorch 'mean' reduction for weighted NLLLoss with ignore_index.
    return jnp.sum(num_p) / jnp.sum(den_p)


def _reference(outputs, targets, weight, ignore_label=255):
    # Pure-JAX reference of F.log_softmax + NLLLoss(weight, ignore_index).
    logp = jax.nn.log_softmax(outputs.astype(jnp.float32), axis=1)
    N, C, H, W = outputs.shape
    logp = jnp.transpose(logp, (0, 2, 3, 1)).reshape(-1, C)
    tgt = targets.reshape(-1)
    valid = tgt != ignore_label
    tgt_safe = jnp.where(valid, tgt, 0)
    picked = jnp.take_along_axis(logp, tgt_safe[:, None], axis=1)[:, 0]
    w = weight[tgt_safe]
    num = jnp.sum(jnp.where(valid, -picked * w, 0.0))
    den = jnp.sum(jnp.where(valid, w, 0.0))
    return num / den


if __name__ == "__main__":
    key = jax.random.PRNGKey(0)
    k1, k2, k3, k4 = jax.random.split(key, 4)
    ignore_label = 255

    # Case 1: N=2, C=4, 16x16, class weights, a few ignored pixels.
    N, C, H, W = 2, 4, 16, 16
    outputs = jax.random.normal(k1, (N, C, H, W), dtype=jnp.float32)
    targets = jax.random.randint(k2, (N, H, W), 0, C, dtype=jnp.int32)
    targets = targets.at[0, 0, :4].set(ignore_label)
    class_weight = jnp.linspace(0.5, 2.0, C, dtype=jnp.float32)

    loss = cross_entropy_loss_2d(outputs, targets, class_weight,
                                 ignore_label=ignore_label)
    loss = jax.block_until_ready(loss)
    ref = _reference(outputs, targets, class_weight, ignore_label)
    if not jnp.allclose(loss, ref, rtol=1e-5, atol=1e-5):
        raise AssertionError(f"case1 mismatch: pallas={loss} ref={ref}")

    # Case 2: ragged spatial extent (HW not a multiple of the tile),
    # no class weights, exercises the in-kernel mask and parallel partials.
    N2, C2, H2, W2 = 1, 3, 10, 20
    outputs2 = jax.random.normal(k3, (N2, C2, H2, W2), dtype=jnp.float32)
    targets2 = jax.random.randint(k4, (N2, H2, W2), 0, C2, dtype=jnp.int32)
    targets2 = targets2.at[0, 3, 5:9].set(ignore_label)

    loss2 = cross_entropy_loss_2d(outputs2, targets2, None,
                                  ignore_label=ignore_label, tile_hw=128)
    loss2 = jax.block_until_ready(loss2)
    ref2 = _reference(outputs2, targets2, jnp.ones((C2,), jnp.float32),
                      ignore_label)
    if not jnp.allclose(loss2, ref2, rtol=1e-5, atol=1e-5):
        raise AssertionError(f"case2 mismatch: pallas={loss2} ref={ref2}")

    print("KERNEL_OK")
</pallas_src>

<mosaic_0001>
module attributes {stable_mosaic.version = 11 : i64} {
  func.func @_ce2d_kernel(%arg0: i32, %arg1: i32, %arg2: i32, %arg3: memref<1x4x256xf32, #tpu.memory_space<vmem>>, %arg4: memref<1x1x256xi32, #tpu.memory_space<vmem>>, %arg5: memref<4x1xf32, #tpu.memory_space<vmem>>, %arg6: memref<1x1x1x1xf32, #tpu.memory_space<vmem>>, %arg7: memref<1x1x1x1xf32, #tpu.memory_space<vmem>>, %arg8: memref<1x256xf32, #tpu.memory_space<vmem>>, %arg9: memref<1x256xf32, #tpu.memory_space<vmem>>) attributes {dimension_semantics = [#tpu.dimension_semantics<parallel>, #tpu.dimension_semantics<parallel>, #tpu.dimension_semantics<arbitrary>], iteration_bounds = array<i64: 2, 1, 1>, scalar_prefetch = 0 : i64, scratch_operands = 2 : i64, tpu.core_type = #tpu.core_type<tc>, window_params = [{transform_indices = @transform_0, window_bounds = array<i64: 1, 4, 256>}, {transform_indices = @transform_1, window_bounds = array<i64: 1, 1, 256>}, {pipeline_mode = #tpu.pipeline_mode<synchronous>, transform_indices = @transform_2, window_bounds = array<i64: 4, 1>}, {transform_indices = @transform_3, window_bounds = array<i64: 1, 1, 1, 1>}, {transform_indices = @transform_4, window_bounds = array<i64: 1, 1, 1, 1>}]} {
    %c0_i32 = arith.constant 0 : i32
    %0 = arith.cmpi eq, %arg2, %c0_i32 : i32
    %1 = arith.extui %0 : i1 to i32
    %c0_i32_0 = arith.constant 0 : i32
    %2 = arith.cmpi ne, %1, %c0_i32_0 : i32
    scf.if %2 {
      %cst_26 = arith.constant 0.000000e+00 : f32
      %55 = vector.broadcast %cst_26 : f32 to vector<1x256xf32>
      %c0_27 = arith.constant 0 : index
      %c0_28 = arith.constant 0 : index
      %56 = vector.load %arg8[%c0_27, %c0_28] : memref<1x256xf32, #tpu.memory_space<vmem>>, vector<1x256xf32>
      tpu.vector_store %arg8[%c0_27, %c0_28], %55 {strides = array<i32>} : memref<1x256xf32, #tpu.memory_space<vmem>>, vector<1x256xf32>,
      %cst_29 = arith.constant 0.000000e+00 : f32
      %57 = vector.broadcast %cst_29 : f32 to vector<1x256xf32>
      %c0_30 = arith.constant 0 : index
      %c0_31 = arith.constant 0 : index
      %58 = vector.load %arg9[%c0_30, %c0_31] : memref<1x256xf32, #tpu.memory_space<vmem>>, vector<1x256xf32>
      tpu.vector_store %arg9[%c0_30, %c0_31], %57 {strides = array<i32>} : memref<1x256xf32, #tpu.memory_space<vmem>>, vector<1x256xf32>,
    } else {
    }
    %c0 = arith.constant 0 : index
    %c0_1 = arith.constant 0 : index
    %c0_2 = arith.constant 0 : index
    %3 = vector.load %arg3[%c0, %c0_1, %c0_2] : memref<1x4x256xf32, #tpu.memory_space<vmem>>, vector<1x4x256xf32>
    %4 = vector.shape_cast %3 : vector<1x4x256xf32> to vector<4x256xf32>
    %cst = arith.constant dense<0xFF800000> : vector<256xf32>
    %5 = vector.multi_reduction <maximumf>, %4, %cst [0] : vector<4x256xf32> to vector<256xf32>
    %6 = vector.shape_cast %5 : vector<256xf32> to vector<1x256xf32>
    %7 = vector.broadcast %6 : vector<1x256xf32> to vector<4x256xf32>
    %8 = arith.subf %4, %7 : vector<4x256xf32>
    %9 = math.exp %8 : vector<4x256xf32>
    %cst_3 = arith.constant dense<0.000000e+00> : vector<256xf32>
    %10 = vector.multi_reduction <add>, %9, %cst_3 [0] : vector<4x256xf32> to vector<256xf32>
    %11 = vector.shape_cast %10 : vector<256xf32> to vector<1x256xf32>
    %12 = math.log %11 : vector<1x256xf32>
    %c0_4 = arith.constant 0 : index
    %c0_5 = arith.constant 0 : index
    %c0_6 = arith.constant 0 : index
    %13 = vector.load %arg4[%c0_4, %c0_5, %c0_6] : memref<1x1x256xi32, #tpu.memory_space<vmem>>, vector<1x1x256xi32>
    %14 = vector.shape_cast %13 : vector<1x1x256xi32> to vector<1x256xi32>
    %15 = tpu.iota {dimensions = array<i32: 0>} : vector<4x256xi32>
    %16 = vector.broadcast %14 : vector<1x256xi32> to vector<4x256xi32>
    %17 = arith.cmpi eq, %15, %16 : vector<4x256xi32>
    %c0_7 = arith.constant 0 : index
    %c0_8 = arith.constant 0 : index
    %18 = vector.load %arg5[%c0_7, %c0_8] : memref<4x1xf32, #tpu.memory_space<vmem>>, vector<4x1xf32>
    %cst_9 = arith.constant 0.000000e+00 : f32
    %19 = vector.broadcast %cst_9 : f32 to vector<4x256xf32>
    %20 = arith.select %17, %8, %19 : vector<4x256xi1>, vector<4x256xf32>
    %cst_10 = arith.constant dense<0.000000e+00> : vector<256xf32>
    %21 = vector.multi_reduction <add>, %20, %cst_10 [0] : vector<4x256xf32> to vector<256xf32>
    %22 = vector.shape_cast %21 : vector<256xf32> to vector<1x256xf32>
    %cst_11 = arith.constant 0.000000e+00 : f32
    %23 = vector.shape_cast %18 : vector<4x1xf32> to vector<4x1xf32>
    %24 = vector.broadcast %23 : vector<4x1xf32> to vector<4x256xf32>
    %25 = vector.broadcast %cst_11 : f32 to vector<4x256xf32>
    %26 = arith.select %17, %24, %25 : vector<4x256xi1>, vector<4x256xf32>
    %cst_12 = arith.constant dense<0.000000e+00> : vector<256xf32>
    %27 = vector.multi_reduction <add>, %26, %cst_12 [0] : vector<4x256xf32> to vector<256xf32>
    %28 = vector.shape_cast %27 : vector<256xf32> to vector<1x256xf32>
    %29 = arith.subf %12, %22 : vector<1x256xf32>
    %30 = arith.mulf %28, %29 : vector<1x256xf32>
    %31 = tpu.iota {dimensions = array<i32: 1>} : vector<1x256xi32>
    %c1_i32 = arith.constant 1 : i32
    %32 = arith.muli %arg1, %c1_i32 : i32
    %33 = arith.addi %32, %arg2 : i32
    %c256_i32 = arith.constant 256 : i32
    %34 = arith.muli %33, %c256_i32 : i32
    %35 = vector.broadcast %34 : i32 to vector<1x256xi32>
    %36 = arith.addi %35, %31 : vector<1x256xi32>
    %c256_i32_13 = arith.constant 256 : i32
    %37 = vector.broadcast %c256_i32_13 : i32 to vector<1x256xi32>
    %38 = arith.cmpi slt, %36, %37 : vector<1x256xi32>
    %c255_i32 = arith.constant 255 : i32
    %39 = vector.broadcast %c255_i32 : i32 to vector<1x256xi32>
    %40 = arith.cmpi ne, %14, %39 : vector<1x256xi32>
    %41 = arith.andi %38, %40 : vector<1x256xi1>
    %c0_14 = arith.constant 0 : index
    %c0_15 = arith.constant 0 : index
    %42 = vector.load %arg8[%c0_14, %c0_15] : memref<1x256xf32, #tpu.memory_space<vmem>>, vector<1x256xf32>
    %cst_16 = arith.constant 0.000000e+00 : f32
    %43 = vector.broadcast %cst_16 : f32 to vector<1x256xf32>
    %44 = arith.select %41, %30, %43 : vector<1x256xi1>, vector<1x256xf32>
    %45 = arith.addf %42, %44 : vector<1x256xf32>
    %c0_17 = arith.constant 0 : index
    %c0_18 = arith.constant 0 : index
    %46 = vector.load %arg8[%c0_17, %c0_18] : memref<1x256xf32, #tpu.memory_space<vmem>>, vector<1x256xf32>
    tpu.vector_store %arg8[%c0_17, %c0_18], %45 {strides = array<i32>} : memref<1x256xf32, #tpu.memory_space<vmem>>, vector<1x256xf32>,
    %c0_19 = arith.constant 0 : index
    %c0_20 = arith.constant 0 : index
    %47 = vector.load %arg9[%c0_19, %c0_20] : memref<1x256xf32, #tpu.memory_space<vmem>>, vector<1x256xf32>
    %cst_21 = arith.constant 0.000000e+00 : f32
    %48 = vector.broadcast %cst_21 : f32 to vector<1x256xf32>
    %49 = arith.select %41, %28, %48 : vector<1x256xi1>, vector<1x256xf32>
    %50 = arith.addf %47, %49 : vector<1x256xf32>
    %c0_22 = arith.constant 0 : index
    %c0_23 = arith.constant 0 : index
    %51 = vector.load %arg9[%c0_22, %c0_23] : memref<1x256xf32, #tpu.memory_space<vmem>>, vector<1x256xf32>
    tpu.vector_store %arg9[%c0_22, %c0_23], %50 {strides = array<i32>} : memref<1x256xf32, #tpu.memory_space<vmem>>, vector<1x256xf32>,
    %c0_i32_24 = arith.constant 0 : i32
    %52 = arith.cmpi eq, %arg2, %c0_i32_24 : i32
    %53 = arith.extui %52 : i1 to i32
    %c0_i32_25 = arith.constant 0 : i32
    %54 = arith.cmpi ne, %53, %c0_i32_25 : i32
    scf.if %54 {
      %c0_26 = arith.constant 0 : index
      %c0_27 = arith.constant 0 : index
      %55 = vector.load %arg8[%c0_26, %c0_27] : memref<1x256xf32, #tpu.memory_space<vmem>>, vector<1x256xf32>
      %cst_28 = arith.constant dense<0.000000e+00> : vector<1xf32>
      %56 = vector.multi_reduction <add>, %55, %cst_28 [1] : vector<1x256xf32> to vector<1xf32>
      %57 = vector.shape_cast %56 : vector<1xf32> to vector<1x1xf32>
      %c0_29 = arith.constant 0 : index
      %c0_30 = arith.constant 0 : index
      %58 = vector.load %arg9[%c0_29, %c0_30] : memref<1x256xf32, #tpu.memory_space<vmem>>, vector<1x256xf32>
      %cst_31 = arith.constant dense<0.000000e+00> : vector<1xf32>
      %59 = vector.multi_reduction <add>, %58, %cst_31 [1] : vector<1x256xf32> to vector<1xf32>
      %60 = vector.shape_cast %59 : vector<1xf32> to vector<1x1xf32>
      %61 = vector.shape_cast %57 : vector<1x1xf32> to vector<1x1x1x1xf32>
      %c0_32 = arith.constant 0 : index
      %c0_33 = arith.constant 0 : index
      %c0_34 = arith.constant 0 : index
      %c0_35 = arith.constant 0 : index
      %62 = vector.load %arg6[%c0_32, %c0_33, %c0_34, %c0_35] : memref<1x1x1x1xf32, #tpu.memory_space<vmem>>, vector<1x1x1x1xf32>
      tpu.vector_store %arg6[%c0_32, %c0_33, %c0_34, %c0_35], %61 {strides = array<i32>} : memref<1x1x1x1xf32, #tpu.memory_space<vmem>>, vector<1x1x1x1xf32>,
      %63 = vector.shape_cast %60 : vector<1x1xf32> to vector<1x1x1x1xf32>
      %c0_36 = arith.constant 0 : index
      %c0_37 = arith.constant 0 : index
      %c0_38 = arith.constant 0 : index
      %c0_39 = arith.constant 0 : index
      %64 = vector.load %arg7[%c0_36, %c0_37, %c0_38, %c0_39] : memref<1x1x1x1xf32, #tpu.memory_space<vmem>>, vector<1x1x1x1xf32>
      tpu.vector_store %arg7[%c0_36, %c0_37, %c0_38, %c0_39], %63 {strides = array<i32>} : memref<1x1x1x1xf32, #tpu.memory_space<vmem>>, vector<1x1x1x1xf32>,
    } else {
    }
    return
  }
  func.func @transform_0(%arg0: i32, %arg1: i32, %arg2: i32) -> (i32, i32, i32) {
    %c1_i32 = arith.constant 1 : i32
    %0 = arith.muli %arg1, %c1_i32 : i32
    %1 = arith.addi %0, %arg2 : i32
    %c0_i32 = arith.constant 0 : i32
    %c0_i32_0 = arith.constant 0 : i32
    return %arg0, %c0_i32, %1 : i32, i32, i32
  }
  func.func @transform_1(%arg0: i32, %arg1: i32, %arg2: i32) -> (i32, i32, i32) {
    %c1_i32 = arith.constant 1 : i32
    %0 = arith.muli %arg1, %c1_i32 : i32
    %1 = arith.addi %0, %arg2 : i32
    %c0_i32 = arith.constant 0 : i32
    %c0_i32_0 = arith.constant 0 : i32
    return %arg0, %c0_i32, %1 : i32, i32, i32
  }
  func.func @transform_2(%arg0: i32, %arg1: i32, %arg2: i32) -> (i32, i32) {
    %c0_i32 = arith.constant 0 : i32
    %c0_i32_0 = arith.constant 0 : i32
    %c0_i32_1 = arith.constant 0 : i32
    return %c0_i32, %c0_i32_0 : i32, i32
  }
  func.func @transform_3(%arg0: i32, %arg1: i32, %arg2: i32) -> (i32, i32, i32, i32) {
    %c0_i32 = arith.constant 0 : i32
    %c0_i32_0 = arith.constant 0 : i32
    %c0_i32_1 = arith.constant 0 : i32
    return %arg0, %arg1, %c0_i32, %c0_i32_0 : i32, i32, i32, i32
  }
  func.func @transform_4(%arg0: i32, %arg1: i32, %arg2: i32) -> (i32, i32, i32, i32) {
    %c0_i32 = arith.constant 0 : i32
    %c0_i32_0 = arith.constant 0 : i32
    %c0_i32_1 = arith.constant 0 : i32
    return %arg0, %arg1, %c0_i32, %c0_i32_0 : i32, i32, i32, i32
  }
}

</mosaic_0001>

<bundles_post_ra>
// kernel: tpu_custom_call.1
= control target key start
LH: loop header
LB: loop body
LE: loop exit
PB: predicated region body
PF: predicated region fallthrough
CT: control target
= control target key end

     0   :  { %10 = vsyncpa [#allocation5], 0  ;;  %s972_s0 = inlined_call_operand.hbm [shape: f32[2,4,256], index: 0, kind: input, shape index: {}]   ;;  %s973_s1 = inlined_call_operand.vmem [shape: s32[2,1,256], index: 1, kind: input, shape index: {}]   ;;  %s974_s2 = inlined_call_operand.vmem [shape: f32[4,1], index: 2, kind: input, shape index: {}]   ;;  %s975_s3 = inlined_call_operand.vmem [shape: f32[2,1,1,1], index: 3, kind: output, shape index: {0}]   ;;  %s976_s4 = inlined_call_operand.vmem [shape: f32[2,1,1,1], index: 4, kind: output, shape index: {1}]  }
   0x1   :  { %12 = vsyncpa [#allocation5 + $0x1], 0  ;;  %s817_s15 = smov 0   ;;  %s819_s16 = smov 0  }
   0x2   :  { %s821_s17 = smov 0   ;;  %s823_s18 = smov 0  }
   0x3   :  { %s825_s19 = smov 0   ;;  %s827_s20 = smov 0  }
   0x4 LB: > { %s631_s21 = sadd.s32 4294967295, %s788_s20   ;;  %s37_s22 = sadd.s32 1, %s784_s19  ;;  %s788_s20 = sphi %s827_s20, %s18_s20   ;;  %s784_s19 = sphi %s825_s19, %s991_s19   ;;  %s780_s18 = sphi %s823_s18, %s990_s18   ;;  %s776_s17 = sphi %s821_s17, %s989_s17   ;;  %s772_s16 = sphi %s819_s16, %s988_s16   ;;  %s768_s15 = sphi %s817_s15, %s987_s15  }
   0x5   : > { %p39_p0 = scmp.ge.s32.totalorder %s37_s22, 2  ;;  %s48_s23 = sadd.s32 1, %s776_s17 }
   0x6   : > { %p55_p1 = scmp.ne.s32.totalorder %s776_s17, %s772_s16  ;;  %p56_p2 = scmp.eq.s32.totalorder %s788_s20, 0 }
   0x7   : > { %s993_s22 = smov (%p39_p0, %s37_s22), 0  ;;  %p61_p4 = scmp.ne.s32.totalorder %s772_s16, %s768_s15 }
   0x8   : > { %p853_p3 = por %p56_p2, %p55_p1  ;;  %s43_s25 = ssub.s32 %s784_s19, %s993_s22 }
   0x9   : > { %p62_p5 = scmp.eq.s32.totalorder %s631_s21, 0  ;;  %p46_p6 = scmp.eq.s32.totalorder %s43_s25, 0 }
   0xa   : > { %p650_p8 = scmp.lt.s32.totalorder %s788_s20, 2  ;;  %s195_s28 = sand.u32 1, %s776_s17  }
   0xb   : > { %p860_p7 = por %p62_p5, %p61_p4  ;;  %s643_s29 = sshll.u32 %s784_s19, 3 }
   0xc   : > { %s866_s27 = scalar_select %p46_p6, %s776_s17, %s48_s23  }
   0xd   : > { %s635_s30 = sshll.u32 %s195_s28, 3  ;;  %s207_s7 = scalar_lea.hbm %s972_s0, %s643_s29 }
   0xe   : > { %s209_s8 = sshll.u32 %s207_s7, 4  ;;  %s199_s9 = scalar_lea.vmem [#allocation4], %s635_s30  ;;  %s210_s8 = int_to_ptr.hbm [resolvable:$true] %s209_s8 }
   0xf   : > { %s211_s10 = sshll.u32 %s199_s9, 4  ;;  %p647_p9 = pnand %p650_p8, %p853_p3  ;;  %s212_s10 = int_to_ptr.vmem [resolvable:$true] %s211_s10 }
  0x10   : > { %p638_p10 = scmp.ge.s32.totalorder %s788_s20, 1  ;;  %p230_p11 = scmp.lt.s32.totalorder %s788_s20, 3 }
  0x11   : > { %s196_s11 = scalar_lea.sflag [#allocation5], %s195_s28 }
  0x12   : > { %649 = dma.hbm_to_vmem [thread:$0]  (!%p647_p9), %s210_s8, 128, %s212_s10, %s196_s11  }
  0x13   : > { %p231_p12 = pnand %p638_p10, %p230_p11 }
  0x14   : > { %s236_s12 = sand.u32 (!%p231_p12), 1, %s772_s16  }
  0x15   : > { %234 = sbr.rel (%p231_p12) target bundleno = 296 (0x128), region = 32  ;;  %s639_s13 = sshll.u32 (!%p231_p12), %s236_s12, 3 }
  0x16   : > { %s237_s14 = scalar_lea.sflag (!%p231_p12), [#allocation5], %s236_s12  ;;  %s240_s15 = scalar_lea.vmem (!%p231_p12), [#allocation4], %s639_s13 }
  0x1a   : > { %763 = dma.done.wait (%p860_p7), %s237_s14, 128  }
  0x1b   : > { %765 = vsyncadd (%p860_p7), %s237_s14, 4294967168  ;;  %v311_v0 = vlaneseq  ;;  %v790_v1 = vmov 0   ;;  %v791_v3 = vmov 0.0   ;;  %v378_v4 = vld [vmem:[%s974_s2] sm:$0xf]  ;;  %v317_v5 = vld [vmem:[%s240_s15] sm:$0xff] }
  0x1c   : > { %701 = vset.pattern.permute.xlu0 %v790_v1  ;;  %319 = vst [vmem:[#allocation1] ss:$2 sm:$0xff] %v317_v5  ;;  %vm324_vm1 = vcmask 1043456   ;;  %p286_p13 = scmp.lt.s32.totalorder %s780_s18, 1  ;;  %vm450_vm7 = vcmask 1040384   ;;  %vm494_vm8 = vcmask 0  }
  0x1d   : > { %vm883_vm0 = vcmp.lt.s32.totalorder %v311_v0, 256  ;;  %403 = vperm.xlu0 %701, %v378_v4   ;;  %v373_v32 = vshrl.u32 %v311_v0, 7 }
  0x1e   : > { %315 = vst.msk [vmem:[#allocation2] sm:$0x3] %vm883_vm0, %v791_v3  ;;  %s995_s18 = smov (!%p286_p13, %s780_s18), 1 }
  0x1f   : > { %316 = vst.msk [vmem:[#allocation3] sm:$0x3] %vm883_vm0, %v791_v3  ;;  %s640_s24 = sshll.u32 %s995_s18, 1  ;;  %s306_s5 = scalar_lea.vmem %s976_s4, %s995_s18 }
  0x20   : > { %s292_s28 = scalar_lea.vmem %s973_s1, %s640_s24  ;;  %s300_s8 = scalar_lea.vmem %s975_s3, %s995_s18 }
  0x21   : > { %v371_v29 = vld [vmem:[%s292_s28] sm:$0x3] }
  0x22   : > { %v374_v34 = vperm.slane %v371_v29, 0  ;;  %v375_v36 = vperm.slane %v371_v29, 1  ;;  %vm436_vm4 = vcmp.ne.s32.totalorder %v371_v29, 255 }
  0x23   : > { %v321_v6 = vld.sshfl [vmem:[#allocation1 + $0x8] sm:$0xff pattern:$0x75316420]  ;;  %v320_v8 = vld.sshfl [vmem:[#allocation1] sm:$0xff pattern:$0x75316420] }
  0x24   : > { %v332_v7 = vsel %vm324_vm1, %v321_v6, -inf  ;;  %v325_v10 = vsel %vm324_vm1, %v320_v8, -inf  ;;  %vm907_vm2 = vcmp.eq.s32.totalorder %v373_v32, %v374_v34  ;;  %vm911_vm3 = vcmp.eq.s32.totalorder %v373_v32, %v375_v36 }
  0x25   : > { %v333_v9 = vrot.slane %v332_v7, 4  ;;  %v326_v11 = vrot.slane %v325_v10, 4  ;;  %v444_v41 = vld [vmem:[#allocation2] sm:$0x3] }
  0x26   : > { %v459_v36 = vld [vmem:[#allocation3] sm:$0x3] }
  0x27   : > { %v334_v12 = vmax.f32 %v332_v7, %v333_v9  ;;  %v327_v13 = vmax.f32 %v325_v10, %v326_v11 }
  0x29   : > { %v335_v14 = vrot.slane %v334_v12, 2  ;;  %v328_v15 = vrot.slane %v327_v13, 2 }
  0x2b   : > { %v336_v16 = vmax.f32 %v334_v12, %v335_v14  ;;  %v329_v17 = vmax.f32 %v327_v13, %v328_v15  ;;  %v437_v12 = vsel %vm436_vm4, 1, %v790_v1 }
  0x2d   : > { %v337_v18 = vrot.slane %v336_v16, 1  ;;  %v330_v19 = vrot.slane %v329_v17, 1 }
  0x2f   : > { %v338_v20 = vmax.f32 %v336_v16, %v337_v18  ;;  %v331_v21 = vmax.f32 %v329_v17, %v330_v19 }
  0x31   : > { %v341_v22 = vrot.slane %v338_v20, 4 }
  0x33   : > { %v342_v23 = vsel %vm324_vm1, %v331_v21, %v341_v22  ;;  %v438_v21 = vperm.slane %v437_v12, 0  ;;  %v439_v22 = vperm.slane %v437_v12, 1 }
  0x34   : > { %v344_v24 = vsub.f32 %v317_v5, %v342_v23 }
  0x35   : > { %vm928_vm5 = vcmp.ne.s32.totalorder %v438_v21, 0  ;;  %vm441_vm6 = vcmp.ne.s32.totalorder %v439_v22, 0 }
  0x36   : > { %v345_v25 = vmul.f32 1.442695, %v344_v24 }
  0x38   : > { %702 = vpow2.f32 %v345_v25 }
  0x3e   : > { %v703_v26 = vpop.eup %702 }
  0x3f   : > { %348 = vst [vmem:[#allocation1] ss:$2 sm:$0xff] %v703_v26 }
  0x46   : > { %v349_v27 = vld.sshfl [vmem:[#allocation1] sm:$0xff pattern:$0x75316420]  ;;  %v350_v28 = vld.sshfl [vmem:[#allocation1 + $0x8] sm:$0xff pattern:$0x75316420] }
  0x47   : > { %380 = vst [vmem:[#allocation1] ss:$2 sm:$0xff] %v344_v24  ;;  %v353_v30 = vsel %vm324_vm1, %v349_v27, 0.0  ;;  %v360_v31 = vsel %vm324_vm1, %v350_v28, 0.0 }
  0x48   : > { %v354_v33 = vrot.slane %v353_v30, 4  ;;  %v361_v35 = vrot.slane %v360_v31, 4 }
  0x4a   : > { %v355_v37 = vadd.f32 %v354_v33, %v353_v30  ;;  %v362_v40 = vadd.f32 %v361_v35, %v360_v31 }
  0x4c   : > { %v356_v44 = vrot.slane %v355_v37, 2  ;;  %v363_v46 = vrot.slane %v362_v40, 2 }
  0x4e   : > { %v381_v39 = vld.sshfl [vmem:[#allocation1] sm:$0xff pattern:$0x75316420]  ;;  %v382_v42 = vld.sshfl [vmem:[#allocation1 + $0x8] sm:$0xff pattern:$0x75316420]  ;;  %v357_v49 = vadd.f32 %v356_v44, %v355_v37  ;;  %v364_v50 = vadd.f32 %v363_v46, %v362_v40 }
  0x4f   : > { %v385_v43 = vsel %vm907_vm2, %v381_v39, 0.0  ;;  %v386_v45 = vsel %vm911_vm3, %v382_v42, 0.0 }
  0x50   : > { %v387_v47 = vsel %vm324_vm1, %v385_v43, 0.0  ;;  %v394_v48 = vsel %vm324_vm1, %v386_v45, 0.0  ;;  %v358_v53 = vrot.slane %v357_v49, 1  ;;  %v365_v54 = vrot.slane %v364_v50, 1 }
  0x51   : > { %v388_v51 = vrot.slane %v387_v47, 4  ;;  %v395_v52 = vrot.slane %v394_v48, 4 }
  0x52   : > { %v359_v57 = vadd.f32 %v358_v53, %v357_v49  ;;  %v366_v58 = vadd.f32 %v365_v54, %v364_v50 }
  0x53   : > { %v389_v55 = vadd.f32 %v388_v51, %v387_v47  ;;  %v396_v56 = vadd.f32 %v395_v52, %v394_v48 }
  0x54   : > { %704 = vlog2.f32 %v359_v57 }
  0x55   : > { %v390_v59 = vrot.slane %v389_v55, 2  ;;  %v397_v60 = vrot.slane %v396_v56, 2  ;;  %706 = vlog2.f32 %v366_v58 }
  0x57   : > { %v391_v61 = vadd.f32 %v390_v59, %v389_v55  ;;  %v398_v62 = vadd.f32 %v397_v60, %v396_v56 }
  0x59   : > { %v392_v4 = vrot.slane %v391_v61, 1  ;;  %v399_v8 = vrot.slane %v398_v62, 1 }
  0x5a   : > { %v705_v7 = vpop.eup %704 }
  0x5b   : > { %v707_v11 = vpop.eup %706  ;;  %v368_v15 = vmul.f32 0.6931472, %v705_v7  ;;  %v393_v16 = vadd.f32 %v392_v4, %v391_v61  ;;  %v400_v18 = vadd.f32 %v399_v8, %v398_v62 }
  0x5c   : > { %v370_v17 = vmul.f32 0.6931472, %v707_v11 }
  0x5d   : > { %v422_v27 = vsub.f32 %v368_v15, %v393_v16 }
  0x5e   : > { %v423_v28 = vsub.f32 %v370_v17, %v400_v18 }
  0x8f   : > { %v404_v63 = vpop.permute.xlu0 %403 }
  0x90   : > { %v406_v0 = vsel %vm907_vm2, %v404_v63, 0.0  ;;  %v407_v3 = vsel %vm911_vm3, %v404_v63, 0.0 }
  0x91   : > { %v408_v5 = vsel %vm324_vm1, %v406_v0, 0.0  ;;  %v415_v6 = vsel %vm324_vm1, %v407_v3, 0.0 }
  0x92   : > { %v409_v9 = vrot.slane %v408_v5, 4  ;;  %v416_v10 = vrot.slane %v415_v6, 4 }
  0x94   : > { %v410_v13 = vadd.f32 %v409_v9, %v408_v5  ;;  %v417_v14 = vadd.f32 %v416_v10, %v415_v6 }
  0x96   : > { %v411_v19 = vrot.slane %v410_v13, 2  ;;  %v418_v20 = vrot.slane %v417_v14, 2 }
  0x98   : > { %v412_v23 = vadd.f32 %v411_v19, %v410_v13  ;;  %v419_v24 = vadd.f32 %v418_v20, %v417_v14 }
  0x9a   : > { %v413_v25 = vrot.slane %v412_v23, 1  ;;  %v420_v26 = vrot.slane %v419_v24, 1 }
  0x9c   : > { %v414_v1 = vadd.f32 %v413_v25, %v412_v23  ;;  %v421_v30 = vadd.f32 %v420_v26, %v419_v24 }
  0x9e   : > { %v424_v31 = vmul.f32 %v422_v27, %v414_v1  ;;  %v425_v32 = vmul.f32 %v423_v28, %v421_v30  ;;  %v460_v33 = vsel %vm928_vm5, %v414_v1, 0.0  ;;  %v461_v34 = vsel %vm441_vm6, %v421_v30, 0.0 }
  0x9f   : > { %v464_v35 = vrot.slane %v461_v34, 7 }
  0xa0   : > { %v445_v37 = vsel %vm928_vm5, %v424_v31, 0.0  ;;  %v446_v38 = vsel %vm441_vm6, %v425_v32, 0.0 }
  0xa1   : > { %v449_v39 = vrot.slane %v446_v38, 7  ;;  %v465_v40 = vsel %vm450_vm7, %v460_v33, %v464_v35 }
  0xa2   : > { %v467_v42 = vadd.f32 %v465_v40, %v459_v36 }
  0xa3   : > { %v451_v43 = vsel %vm450_vm7, %v445_v37, %v449_v39 }
  0xa4   : > { %468 = vst.msk [vmem:[#allocation3] sm:$0x3] %vm883_vm0, %v467_v42  ;;  %v453_v44 = vadd.f32 %v451_v43, %v444_v41 }
  0xa6   : > { %458 = vst.msk [vmem:[#allocation2] sm:$0x3] %vm883_vm0, %v453_v44 }
  0xab   : > { %v483_v45 = vld [vmem:[#allocation3] sm:$0x3] }
  0xac   : > { %v485_v46 = vperm.slane %v483_v45, 0  ;;  %v486_v47 = vperm.slane %v483_v45, 1 }
  0xad   : > { %v472_v48 = vld [vmem:[#allocation2] sm:$0x3] }
  0xae   : > { %v489_v49 = vsel %vm450_vm7, %v485_v46, 0.0  ;;  %v490_v50 = vsel %vm450_vm7, %v486_v47, 0.0  ;;  %v474_v51 = vperm.slane %v472_v48, 0  ;;  %v475_v52 = vperm.slane %v472_v48, 1 }
  0xaf   : > { %v491_v53 = vadd.f32 %v490_v50, %v489_v49 }
  0xb0   : > { %v478_v54 = vsel %vm450_vm7, %v474_v51, 0.0  ;;  %v479_v55 = vsel %vm450_vm7, %v475_v52, 0.0 }
  0xb1   : > { %492 = vadd.xlane.f32.xlu1 %v491_v53  ;;  %v480_v2 = vadd.f32 %v479_v55, %v478_v54 }
  0xb3   : > { %481 = vadd.xlane.f32.xlu0 %v480_v2 }
 0x124   : > { %v493_v56 = vpop.xlane.xlu1 %492 }
 0x125   : > { %496 = vst.msk [vmem:[%s306_s5] sm:$0x1] %vm494_vm8, %v493_v56 }
 0x126   : > { %v482_v57 = vpop.xlane.xlu0 %481 }
 0x127   : > { %495 = vst.msk [vmem:[%s300_s8] sm:$0x1] %vm494_vm8, %v482_v57 }
 0x128 PF: > { %s18_s20 = sadd.s32 1, %s788_s20   ;;  %s987_s15 = smov %s772_s16 }
 0x129   : > { %p15_p0 = scmp.ge.s32.totalorder %s18_s20, 4   ;;  %s988_s16 = smov %s776_s17 }
 0x12a   : > { %s989_s17 = smov %s866_s27  ;;  %s990_s18 = smov %s784_s19 }
 0x12b   : > { %s991_s19 = smov %s993_s22  ;;  %17 = sbr.rel (!%p15_p0) target bundleno = 4 (0x4), region = 95 }
 0x130   :  { %538 = vsyncpa [#allocation5], 1 }
 0x131   :  { %540 = vsyncpa [#allocation5 + $0x1], 1 }

</bundles_post_ra>
